<compile_context>
chip_gen: v7x
topology: tpu7x:2x2x1
jax: 0.10.0
libtpu: 0.0.40
codegen_flags: <defaults>
</compile_context>

<pallas_src>
import math

import jax
import jax.numpy as jnp
from jax import lax
from jax.experimental import pallas as pl
from jax.experimental.pallas import tpu as pltpu

EPS = 1e-5  # nn.LayerNorm default eps


def _round_up(x, m):
    return ((x + m - 1) // m) * m


_VMEM_LIMIT_CACHE = None


def _vmem_limit_bytes():
    """Per-generation VMEM budget: ~3/4 of physical, capped at 100 MiB."""
    global _VMEM_LIMIT_CACHE
    if _VMEM_LIMIT_CACHE is None:
        cap = 0
        try:
            cap = int(getattr(pltpu.get_tpu_info(), "vmem_capacity_bytes", 0) or 0)
        except Exception:
            cap = 0
        if cap <= 0:
            cap = 64 * 1024 * 1024  # conservative fallback (v7x physical)
        _VMEM_LIMIT_CACHE = int(min(cap * 3 // 4, 100 * 1024 * 1024))
    return _VMEM_LIMIT_CACHE


def _layer_norm(x, w, b):
    mu = jnp.mean(x, axis=-1, keepdims=True)
    var = jnp.mean((x - mu) ** 2, axis=-1, keepdims=True)
    return (x - mu) * lax.rsqrt(var + EPS) * w + b


def _const_spec(shape):
    nd = len(shape)
    return pl.BlockSpec(shape, lambda i, _nd=nd: (0,) * _nd)


# ---------------------------------------------------------------------------
# Kernel 1: embed_standart (Linear) + ReLU, row-tiled over the B*S tokens.
# f32 activation in, bf16 cast on the VPU inside the kernel (hidden under MXU).
# ---------------------------------------------------------------------------
def _embed_kernel(x_ref, w_ref, b_ref, o_ref):
    x = x_ref[...].astype(jnp.bfloat16)
    y = jnp.dot(x, w_ref[...], preferred_element_type=jnp.float32) + b_ref[...]
    o_ref[...] = jnp.maximum(y, 0.0).astype(o_ref.dtype)


def embed_relu(x2d, w_bf16, b_f32, tm=512):
    M, C = x2d.shape
    D = w_bf16.shape[1]
    tm = min(tm, _round_up(M, 8))
    cost = pl.CostEstimate(
        flops=2 * M * C * D, transcendentals=0,
        bytes_accessed=M * C * 4 + C * D * 2 + M * D * 2)
    return pl.pallas_call(
        _embed_kernel,
        grid=(pl.cdiv(M, tm),),
        in_specs=[pl.BlockSpec((tm, C), lambda i: (i, 0)),
                  _const_spec((C, D)),        # weight resident (constant index map)
                  _const_spec((1, D))],
        out_specs=pl.BlockSpec((tm, D), lambda i: (i, 0)),
        out_shape=jax.ShapeDtypeStruct((M, D), jnp.bfloat16),
        compiler_params=pltpu.CompilerParams(
            dimension_semantics=("parallel",), vmem_limit_bytes=_vmem_limit_bytes()),
        cost_estimate=cost,
    )(x2d, w_bf16, b_f32)


# ---------------------------------------------------------------------------
# Kernel 2: one TransformerDecoderLayerOptimal step (cross-attn + FFN + LNs).
# Grid over batch; `bt` (<=2) batch elements per step, processed with plain
# per-batch 2-D matmuls (no sublane-crossing reshapes).  Query path is
# precomputed in the wrapper and q arrives pre-split per head.
# vec rows: 0 bk, 1 bv, 2 bo, 3 b2, 4 ln2w, 5 ln2b, 6 ln3w, 7 ln3b.
# ---------------------------------------------------------------------------
def _make_decoder_kernel(nhead, bt):
    def kernel(mem_ref, tgt0_ref, q3_ref, wk_ref, wv_ref, wo_ref,
               w1_ref, b1_ref, w2_ref, vec_ref, out_ref, acc_ref):
        f32, bf16 = jnp.float32, jnp.bfloat16
        hd = q3_ref.shape[2]
        vec = vec_ref[...]
        bk, bv, bo, b2 = vec[0:1], vec[1:2], vec[2:3], vec[3:4]
        ln2w, ln2b, ln3w, ln3b = vec[4:5], vec[5:6], vec[6:7], vec[7:8]
        tgt0 = tgt0_ref[...]                              # (L, D) f32
        wo = wo_ref[...]

        for b in range(bt):
            mem_b = mem_ref[b]                            # (S, D) bf16
            kb = (jnp.dot(mem_b, wk_ref[...], preferred_element_type=f32)
                  + bk).astype(bf16)                      # (S, D)
            vb = (jnp.dot(mem_b, wv_ref[...], preferred_element_type=f32)
                  + bv).astype(bf16)                      # (S, D)

            # per-head attention; head outputs accumulate into VMEM scratch so a
            # single K=D output projection follows (no concat, no per-head fold)
            for h in range(nhead):
                sl = slice(h * hd, (h + 1) * hd)
                qh = q3_ref[h]                            # (L, hd) bf16, pre-scaled
                s = lax.dot_general(qh, kb[:, sl], (((1,), (1,)), ((), ())),
                                    preferred_element_type=f32)       # (L, S)
                s = s - jnp.max(s, axis=-1, keepdims=True)
                p = jnp.exp(s)
                p = p * pl.reciprocal(jnp.sum(p, axis=-1, keepdims=True),
                                      approx=True)
                acc_ref[:, sl] = jnp.dot(p.astype(bf16), vb[:, sl],
                                         preferred_element_type=f32)  # (L, hd)

            a = acc_ref[...].astype(bf16)                 # (L, D)
            attn = jnp.dot(a, wo, preferred_element_type=f32) + bo
            x1 = _layer_norm(tgt0 + attn, ln2w, ln2b)     # dropout2 == identity

            ff = jnp.dot(x1.astype(bf16), w1_ref[...],
                         preferred_element_type=f32) + b1_ref[...]
            ff = jnp.maximum(ff, 0.0)
            ff = jnp.dot(ff.astype(bf16), w2_ref[...],
                         preferred_element_type=f32) + b2
            x2 = _layer_norm(x1 + ff, ln3w, ln3b)         # dropout3 == identity
            out_ref[b] = x2.astype(out_ref.dtype)
    return kernel


def _pick_bt(B):
    # Prefer an even number of grid steps (both v7x TensorCores get equal work)
    # while keeping the per-step unroll small (bt <= 2).
    for bt in (2, 1):
        if B % bt == 0 and (B // bt) >= 2 and (B // bt) % 2 == 0:
            return bt
    for bt in (2, 1):
        if B % bt == 0:
            return bt
    return 1


def decoder_layer(mem, tgt0, q3, prep, nhead):
    B, S, D = mem.shape
    L = tgt0.shape[0]
    F = prep["w1"].shape[1]
    hd = D // nhead
    bt = _pick_bt(B)
    nb = B // bt

    flops = (4 * B * S * D * D + 4 * B * L * S * D
             + 2 * B * L * D * D + 4 * B * L * D * F)
    cost = pl.CostEstimate(
        flops=flops, transcendentals=B * nhead * L * S,
        bytes_accessed=(B * S * D * 2 + (3 * D * D + 2 * D * F) * 2
                        + B * L * D * 2))
    in_specs = [
        pl.BlockSpec((bt, S, D), lambda i: (i, 0, 0)),    # memory slab per step
        _const_spec((L, D)),                              # tgt0 (post-LN1 query)
        _const_spec((nhead, L, hd)),                      # q, pre-scaled, head-major
        _const_spec((D, D)), _const_spec((D, D)), _const_spec((D, D)),  # Wk, Wv, Wo
        _const_spec((D, F)), _const_spec((1, F)),         # W1, b1
        _const_spec((F, D)),                              # W2
        _const_spec((8, D)),                              # packed bias / LN vectors
    ]
    return pl.pallas_call(
        _make_decoder_kernel(nhead, bt),
        grid=(nb,),
        in_specs=in_specs,
        out_specs=pl.BlockSpec((bt, L, D), lambda i: (i, 0, 0)),
        out_shape=jax.ShapeDtypeStruct((B, L, D), jnp.bfloat16),
        scratch_shapes=[pltpu.VMEM((L, D), jnp.float32)],
        compiler_params=pltpu.CompilerParams(
            dimension_semantics=("parallel",), vmem_limit_bytes=_vmem_limit_bytes()),
        cost_estimate=cost,
    )(mem, tgt0, q3, prep["wk"], prep["wv"], prep["wo"],
      prep["w1"], prep["b1"], prep["w2"], prep["vecs"])


# ---------------------------------------------------------------------------
# Kernel 3: GroupFC — per-group matmul h[:, i, :] @ W_i as one batched
# dot_general per grid step; grid over group blocks sized by weight bytes.
# Weights are cast/padded to 128 lanes once at init (not per call).
# ---------------------------------------------------------------------------
def _groupfc_kernel(h_ref, w_ref, o_ref):
    o_ref[...] = lax.dot_general(
        h_ref[...], w_ref[...],
        dimension_numbers=(((2,), (1,)), ((0,), (0,))),
        preferred_element_type=jnp.float32)


def _pick_group_tile(L, D, dup_pad, budget=4 * 1024 * 1024):
    best = 1
    for g in range(1, L + 1):
        if L % g == 0 and g * D * dup_pad * 2 <= budget:
            best = g
    return best


def group_fc(h, w_padded, dup):
    B, L, D = h.shape
    dup_pad = w_padded.shape[-1]
    # TODO(synk): emit the decoder output group-major to avoid this XLA transpose.
    ht = jnp.transpose(h, (1, 0, 2))                      # (L, B, D) bf16
    G = _pick_group_tile(L, D, dup_pad)
    cost = pl.CostEstimate(
        flops=2 * B * L * D * dup_pad, transcendentals=0,
        bytes_accessed=L * B * D * 2 + L * D * dup_pad * 2 + L * B * dup_pad * 4)
    out = pl.pallas_call(
        _groupfc_kernel,
        grid=(L // G,),
        in_specs=[pl.BlockSpec((G, B, D), lambda g: (g, 0, 0)),
                  pl.BlockSpec((G, D, dup_pad), lambda g: (g, 0, 0))],
        out_specs=pl.BlockSpec((G, B, dup_pad), lambda g: (g, 0, 0)),
        out_shape=jax.ShapeDtypeStruct((L, B, dup_pad), jnp.float32),
        compiler_params=pltpu.CompilerParams(
            dimension_semantics=("parallel",), vmem_limit_bytes=_vmem_limit_bytes()),
        cost_estimate=cost,
    )(ht, w_padded)
    return jnp.transpose(out, (1, 0, 2))[:, :, :dup]      # (B, L, dup)


# ---------------------------------------------------------------------------
# Parameter init (deterministic, synthetic — no checkpoint loading).
# Kernel-ready copies (bf16 weights, packed vectors, lane-padded GroupFC
# weights) are built ONCE here, not per forward call.
# ---------------------------------------------------------------------------
def init_params(key, num_classes, num_of_groups, d_model, initial_num_features,
                dim_feedforward, nhead=8):
    L = 256 if num_of_groups < 0 else num_of_groups
    L = min(L, num_classes)
    dup = int(num_classes / L + 0.999)

    ks = jax.random.split(key, 20)

    def xavier(k, shape):
        fan_in, fan_out = shape[-2], shape[-1]
        std = math.sqrt(2.0 / (fan_in + fan_out))
        return jax.random.normal(k, shape, jnp.float32) * std

    def small(k, shape):
        return jax.random.normal(k, shape, jnp.float32) * 0.01

    p = {}
    p["w_embed"] = xavier(ks[0], (initial_num_features, d_model))
    p["b_embed"] = small(ks[1], (d_model,))
    p["query"] = jax.random.normal(ks[2], (L, d_model), jnp.float32)  # nn.Embedding ~ N(0,1)
    p["wq"] = xavier(ks[3], (d_model, d_model)); p["bq"] = small(ks[4], (1, d_model))
    p["wk"] = xavier(ks[5], (d_model, d_model)); p["bk"] = small(ks[6], (1, d_model))
    p["wv"] = xavier(ks[7], (d_model, d_model)); p["bv"] = small(ks[8], (1, d_model))
    p["wo"] = xavier(ks[9], (d_model, d_model)); p["bo"] = small(ks[10], (1, d_model))
    p["ln1w"] = jnp.ones((1, d_model), jnp.float32); p["ln1b"] = jnp.zeros((1, d_model), jnp.float32)
    p["ln2w"] = jnp.ones((1, d_model), jnp.float32); p["ln2b"] = jnp.zeros((1, d_model), jnp.float32)
    p["ln3w"] = jnp.ones((1, d_model), jnp.float32); p["ln3b"] = jnp.zeros((1, d_model), jnp.float32)
    p["w1"] = xavier(ks[11], (d_model, dim_feedforward)); p["b1"] = small(ks[12], (1, dim_feedforward))
    p["w2"] = xavier(ks[13], (dim_feedforward, d_model)); p["b2"] = small(ks[14], (1, d_model))
    p["dup_w"] = xavier(ks[15], (L, d_model, dup))        # xavier_normal per group
    p["dup_b"] = jnp.zeros((num_classes,), jnp.float32)   # constant_(bias, 0)
    p["num_classes"] = num_classes
    p["nhead"] = nhead

    bf16, f32 = jnp.bfloat16, jnp.float32
    dup_pad = _round_up(dup, 128)
    p["prep"] = {
        "w_embed": p["w_embed"].astype(bf16),
        "b_embed": p["b_embed"].reshape(1, d_model).astype(f32),
        "wq": p["wq"].astype(bf16),
        "wk": p["wk"].astype(bf16),
        "wv": p["wv"].astype(bf16),
        "wo": p["wo"].astype(bf16),
        "w1": p["w1"].astype(bf16),
        "b1": p["b1"].astype(f32),
        "w2": p["w2"].astype(bf16),
        "vecs": jnp.concatenate([p["bk"], p["bv"], p["bo"], p["b2"],
                                 p["ln2w"], p["ln2b"], p["ln3w"], p["ln3b"]],
                                axis=0).astype(f32),
        "dup_w": jnp.pad(p["dup_w"].astype(bf16),
                         ((0, 0), (0, 0), (0, dup_pad - dup))),
        "dup": dup,
    }
    return p


# ---------------------------------------------------------------------------
# Full forward (glue reshapes in plain JAX; hot paths in the Pallas kernels).
# ---------------------------------------------------------------------------
def ml_decoder_forward(x, p, nhead=8):
    nhead = p.get("nhead", nhead)
    prep = p["prep"]
    if x.ndim == 4:
        B, C, H, W = x.shape
        es = jnp.transpose(x.reshape(B, C, H * W), (0, 2, 1))       # (B, S, C)
    else:
        es = x
    B, S, C = es.shape
    D = prep["w_embed"].shape[1]
    L = p["query"].shape[0]
    hd = D // nhead

    # Kernel 1: token embedding + ReLU (f32 activation in, bf16 out).
    emb = embed_relu(es.reshape(B * S, C), prep["w_embed"],
                     prep["b_embed"]).reshape(B, S, D)

    # Batch-independent query path hoisted out of the decoder kernel
    # (tiny L x D work; plain JAX, executed once per forward).
    tgt0 = _layer_norm(2.0 * p["query"], p["ln1w"], p["ln1b"])      # (L, D) f32
    q = (jnp.dot(tgt0.astype(jnp.bfloat16), prep["wq"],
                 preferred_element_type=jnp.float32) + p["bq"]) * (1.0 / math.sqrt(hd))
    q3 = jnp.transpose(q.astype(jnp.bfloat16).reshape(L, nhead, hd),
                       (1, 0, 2))                                   # (nhead, L, hd)

    # Kernel 2: decoder layer (cross-attn + FFN).
    h = decoder_layer(emb, tgt0, q3, prep, nhead)                   # (B, L, D) bf16

    # Kernel 3: GroupFC.
    out_extrap = group_fc(h, prep["dup_w"], prep["dup"])            # (B, L, dup) f32
    logits = out_extrap.reshape(B, -1)[:, : p["num_classes"]] + p["dup_b"]
    return logits


# ---------------------------------------------------------------------------
# Pure-JAX reference mirroring the kernels' bf16-operand / f32-accumulate math
# (for correctness check only).
# ---------------------------------------------------------------------------
def ml_decoder_reference(x, p, nhead=8):
    nhead = p.get("nhead", nhead)
    f32, bf16 = jnp.float32, jnp.bfloat16

    def mm(a, b):
        return jnp.dot(a.astype(bf16), b.astype(bf16), preferred_element_type=f32)

    B, C, H, W = x.shape
    es = jnp.transpose(x.reshape(B, C, H * W), (0, 2, 1))          # (B, S, C)
    S = es.shape[1]
    D = p["w_embed"].shape[1]
    emb = jnp.maximum(mm(es.reshape(B * S, C), p["w_embed"]) + p["b_embed"], 0.0)
    emb = emb.astype(bf16).reshape(B, S, D)

    L = p["query"].shape[0]
    hd = D // nhead
    scale = 1.0 / math.sqrt(hd)
    tgt0 = _layer_norm(2.0 * p["query"], p["ln1w"][0], p["ln1b"][0])       # (L, D)
    q = ((mm(tgt0, p["wq"]) + p["bq"]) * scale).astype(bf16)
    k = (mm(emb.reshape(B * S, D), p["wk"]) + p["bk"]).astype(bf16).reshape(B, S, D)
    v = (mm(emb.reshape(B * S, D), p["wv"]) + p["bv"]).astype(bf16).reshape(B, S, D)

    qh = q.reshape(L, nhead, hd)
    kh = k.reshape(B, S, nhead, hd)
    vh = v.reshape(B, S, nhead, hd)
    s = jnp.einsum("lhe,bshe->bhls", qh, kh, preferred_element_type=f32)
    s = s - jnp.max(s, axis=-1, keepdims=True)
    pe = jnp.exp(s)
    pa = pe / jnp.sum(pe, axis=-1, keepdims=True)
    a = jnp.einsum("bhls,bshe->blhe", pa.astype(bf16), vh, preferred_element_type=f32)
    a = a.reshape(B, L, D)
    attn = (mm(a.reshape(B * L, D), p["wo"]) + p["bo"]).reshape(B, L, D)

    t = tgt0[None, :, :] + attn
    t = _layer_norm(t, p["ln2w"][0], p["ln2b"][0])
    ff = jnp.maximum(mm(t.reshape(B * L, D), p["w1"]) + p["b1"], 0.0)
    ff = (mm(ff, p["w2"]) + p["b2"]).reshape(B, L, D)
    t = _layer_norm(t + ff, p["ln3w"][0], p["ln3b"][0])
    hb = t.astype(bf16)

    out = jnp.einsum("bld,ldk->blk", hb, p["dup_w"].astype(bf16),
                     preferred_element_type=f32)
    return out.reshape(B, -1)[:, : p["num_classes"]] + p["dup_b"]


if __name__ == "__main__":
    key = jax.random.PRNGKey(0)
    kx, kp = jax.random.split(key)

    # Small, forward-consistent shapes.
    B, C, H, W = 2, 16, 4, 4           # x: NCHW, initial_num_features = C = 16
    num_classes = 24
    num_of_groups = 8                  # embed_len_decoder = 8, duplicate_factor = 3
    d_model = 32                       # decoder_embedding (divisible by nhead=8)
    dim_feedforward = 2048             # hard-coded in MLDecoder.__init__
    nhead = 8

    x = jax.random.normal(kx, (B, C, H, W), jnp.float32)
    params = init_params(kp, num_classes, num_of_groups, d_model, C,
                         dim_feedforward, nhead=nhead)

    logits = jax.block_until_ready(ml_decoder_forward(x, params))
    assert logits.shape == (B, num_classes), logits.shape

    ref = ml_decoder_reference(x, params)
    max_diff = float(jnp.max(jnp.abs(logits - ref)))
    assert jnp.allclose(logits, ref, rtol=2e-2, atol=2e-2), f"max diff {max_diff}"

    print("KERNEL_OK")
</pallas_src>

<mosaic_0001>
module attributes {stable_mosaic.version = 11 : i64} {
  func.func @_embed_kernel(%arg0: i32, %arg1: memref<32x16xf32, #tpu.memory_space<vmem>>, %arg2: memref<16x32xbf16, #tpu.memory_space<vmem>>, %arg3: memref<1x32xf32, #tpu.memory_space<vmem>>, %arg4: memref<32x32xbf16, #tpu.memory_space<vmem>>) attributes {dimension_semantics = [#tpu.dimension_semantics<parallel>], iteration_bounds = array<i64: 1>, scalar_prefetch = 0 : i64, scratch_operands = 0 : i64, tpu.core_type = #tpu.core_type<tc>, window_params = [{transform_indices = @transform_0, window_bounds = array<i64: 32, 16>}, {pipeline_mode = #tpu.pipeline_mode<synchronous>, transform_indices = @transform_1, window_bounds = array<i64: 16, 32>}, {pipeline_mode = #tpu.pipeline_mode<synchronous>, transform_indices = @transform_2, window_bounds = array<i64: 1, 32>}, {transform_indices = @transform_3, window_bounds = array<i64: 32, 32>}]} {
    %c0 = arith.constant 0 : index
    %c0_0 = arith.constant 0 : index
    %0 = vector.load %arg1[%c0, %c0_0] : memref<32x16xf32, #tpu.memory_space<vmem>>, vector<32x16xf32>
    %1 = arith.truncf %0 : vector<32x16xf32> to vector<32x16xbf16>
    %c0_1 = arith.constant 0 : index
    %c0_2 = arith.constant 0 : index
    %2 = vector.load %arg2[%c0_1, %c0_2] : memref<16x32xbf16, #tpu.memory_space<vmem>>, vector<16x32xbf16>
    %cst = arith.constant dense<0.000000e+00> : vector<32x32xf32>
    %3 = tpu.matmul %1, %2, %cst {dimension_numbers = #tpu.dot_dimension_numbers<[1], [0], [0], [1], [0, 0, 1, 1], [], []>} : vector<32x16xbf16>, vector<16x32xbf16>, vector<32x32xf32> -> vector<32x32xf32>
    %c0_3 = arith.constant 0 : index
    %c0_4 = arith.constant 0 : index
    %4 = vector.load %arg3[%c0_3, %c0_4] : memref<1x32xf32, #tpu.memory_space<vmem>>, vector<1x32xf32>
    %5 = vector.broadcast %4 : vector<1x32xf32> to vector<32x32xf32>
    %6 = arith.addf %3, %5 : vector<32x32xf32>
    %cst_5 = arith.constant 0.000000e+00 : f32
    %7 = vector.broadcast %cst_5 : f32 to vector<32x32xf32>
    %8 = arith.maximumf %6, %7 : vector<32x32xf32>
    %9 = arith.truncf %8 : vector<32x32xf32> to vector<32x32xbf16>
    %c0_6 = arith.constant 0 : index
    %c0_7 = arith.constant 0 : index
    %10 = vector.load %arg4[%c0_6, %c0_7] : memref<32x32xbf16, #tpu.memory_space<vmem>>, vector<32x32xbf16>
    tpu.vector_store %arg4[%c0_6, %c0_7], %9 {strides = array<i32>} : memref<32x32xbf16, #tpu.memory_space<vmem>>, vector<32x32xbf16>,
    return
  }
  func.func @transform_0(%arg0: i32) -> (i32, i32) {
    %c0_i32 = arith.constant 0 : i32
    %c0_i32_0 = arith.constant 0 : i32
    return %arg0, %c0_i32 : i32, i32
  }
  func.func @transform_1(%arg0: i32) -> (i32, i32) {
    %c0_i32 = arith.constant 0 : i32
    %c0_i32_0 = arith.constant 0 : i32
    %c0_i32_1 = arith.constant 0 : i32
    return %c0_i32, %c0_i32_0 : i32, i32
  }
  func.func @transform_2(%arg0: i32) -> (i32, i32) {
    %c0_i32 = arith.constant 0 : i32
    %c0_i32_0 = arith.constant 0 : i32
    %c0_i32_1 = arith.constant 0 : i32
    return %c0_i32, %c0_i32_0 : i32, i32
  }
  func.func @transform_3(%arg0: i32) -> (i32, i32) {
    %c0_i32 = arith.constant 0 : i32
    %c0_i32_0 = arith.constant 0 : i32
    return %arg0, %c0_i32 : i32, i32
  }
}

</mosaic_0001>

<bundles_post_ra>
// kernel: tpu_custom_call.1
= control target key start
LH: loop header
LB: loop body
LE: loop exit
PB: predicated region body
PF: predicated region fallthrough
CT: control target
= control target key end

     0   :  { %vm37_vm0 = vcmask 130048   ;;  %s236_s0 = inlined_call_operand.vmem [shape: f32[32,16], index: 0, kind: input, shape index: {}]   ;;  %s237_s1 = inlined_call_operand.vmem [shape: bf16[16,32], index: 1, kind: input, shape index: {}]   ;;  %s238_s2 = inlined_call_operand.vmem [shape: f32[1,32], index: 2, kind: input, shape index: {}]   ;;  %s239_s3 = inlined_call_operand.hbm [shape: bf16[32,32], index: 3, kind: output, shape index: {}]  }
   0x1   :  { %v158_v0 = vld [vmem:[%s237_s1] sm:$0xff]   ;;  %v17_v2 = vld [vmem:[%s236_s0 + $0x8] sm:$0xff]  ;;  %v18_v3 = vld [vmem:[%s236_s0 + $0x10] sm:$0xff] }
   0x2   :  { %v16_v1 = vld [vmem:[%s236_s0] sm:$0xff]  ;;  %149 = vmatprep.subr.bf16.mxu0 %v158_v0  ;;  %v19_v5 = vld [vmem:[%s236_s0 + $0x18] sm:$0xff] }
   0x3   :  { %v20_v4 = vpack.c.bf16 %v17_v2, %v16_v1 }
   0x4   :  { %8 = vsyncpa [#allocation3], 0  ;;  %150 = vmatpush3.bf16.msra.mxu0 %v158_v0  ;;  %v21_v6 = vpack.c.bf16 %v19_v5, %v18_v3  ;;  %v134_v7 = vld [vmem:[%s238_s2] ss:$0 sm:$0xff]  ;;  %vm113_vm1 = vcmask 257024   ;;  %s183_s0 = smov [#allocation2]  }
   0x5   :  { %151 = vmatprep.mubr.msk.bf16.mxu0 %vm37_vm0, %v20_v4  ;;  %s123_s23 = sshll.u32 %s183_s0, 4  ;;  %s124_s23 = int_to_ptr.vmem [resolvable:$true] %s123_s23 }
   0x6   :  { %s159_s2 = scalar_lea.vmem %s124_s23, 256  ;;  %p164_p1 = scmp.lt.s32.totalorder %s124_s23, %s124_s23 }
   0x7   :  { %152 = vmatmul.mubr.msk.bf16.vlgmr.msra.gmra.mrb[0].mxu0 %vm37_vm0, %v21_v6  ;;  %p160_p0 = scmp.ne.s32.totalorder %s124_s23, %s159_s2  ;;  %p165_p2 = scmp.lt.s32.totalorder %s159_s2, %s159_s2 }
   0x9   :  { %p166_p3 = por %p165_p2, %p164_p1 }
   0xb   :  { %p167_p4 = pnand %p166_p3, %p160_p0 }
  0xda   :  { %v153_v8 = vpop.f32.mrb[0].mxu0 }
  0xdb   :  { %v87_v9 = vadd.f32 %v153_v8, %v134_v7  ;;  %v78_v10 = vpop.f32.mrb[1].mxu0 }
  0xdc   :  { %v79_v11 = vadd.f32 %v134_v7, %v78_v10  ;;  %v154_v12 = vpop.f32.mrb[2].mxu0 }
  0xdd   :  { %v95_v13 = vmax.f32 %v87_v9, 0.0  ;;  %v90_v14 = vadd.f32 %v154_v12, %v134_v7  ;;  %v81_v15 = vpop.f32.mrb[3].mxu0 }
  0xde   :  { %v93_v16 = vmax.f32 %v79_v11, 0.0  ;;  %v82_v17 = vadd.f32 %v134_v7, %v81_v15 }
  0xdf   :  { %v144_v18 = vpack.c.bf16 %v95_v13, %v95_v13  ;;  %v96_v19 = vmax.f32 %v90_v14, 0.0 }
  0xe0   :  { %v142_v20 = vpack.c.bf16 %v93_v16, %v93_v16  ;;  %v94_v21 = vmax.f32 %v82_v17, 0.0 }
  0xe1   :  { %116 = vst.msk [vmem:[#allocation2 + $0x8] sm:$0xf] %vm113_vm1, %v144_v18  ;;  %v145_v22 = vpack.c.bf16 %v96_v19, %v96_v19 }
  0xe2   :  { %114 = vst.msk [vmem:[#allocation2] sm:$0xf] %vm113_vm1, %v142_v20  ;;  %v143_v23 = vpack.c.bf16 %v94_v21, %v94_v21 }
  0xe3   :  { %117 = vst.msk [vmem:[#allocation2 + $0xc] sm:$0xf] %vm113_vm1, %v145_v22 }
  0xe4   :  { %115 = vst.msk [vmem:[#allocation2 + $0x4] sm:$0xf] %vm113_vm1, %v143_v23 }
  0xe5   :  { %170 = shalt.err (!%p167_p4)
}
  0xe6   :  { %s171_s26 = scalar_lea.hbm %s239_s3, 256 }
  0xe7   :  { %p172_p5 = scmp.ne.s32.totalorder %s239_s3, %s171_s26  ;;  %p175_p6 = scmp.lt.u32.totalorder %s171_s26, %s239_s3 }
  0xe9   :  { %p177_p7 = pnand %p175_p6, %p172_p5 }
  0xeb   :  { %180 = shalt.err (!%p177_p7)
}
  0xec   :  { %s184_s4 = smov 64   ;;  %s185_s5 = smov 4  }
  0xed   :  { %129 = dma.vmem_to_hbm [thread:$0]  %s124_s23, 256, %s239_s3, [#allocation3], %s184_s4, %s184_s4, %s185_s5  }
  0xee   :  { %181 = dma.done.wait [#allocation3], 256  }
  0xef   :  { %182 = vsyncadd [#allocation3], 4294967040 }
  0xf0   :  { %133 = vsyncpa [#allocation3], 1 }

</bundles_post_ra>
